<compile_context>
chip_gen: v6e
topology: v6e:2x2x1
jax: 0.10.0
libtpu: 0.0.40
codegen_flags: <defaults>
</compile_context>

<pallas_src>
import functools

import jax
import jax.numpy as jnp
from jax.experimental import pallas as pl
from jax.experimental.pallas import tpu as pltpu


# ---------------------------------------------------------------------------
# Kernels
# ---------------------------------------------------------------------------

def _conv1x1_kernel(x_ref, w_ref, b_ref, o_ref):
    # x_ref: (1, c_in, tn)   channels on sublanes, spatial on lanes
    # w_ref: (c_out, c_in)   resident weight tile (constant index_map)
    # b_ref: (c_out, 1)
    # o_ref: (1, c_out, tn)  lane-dense output store
    acc = jnp.dot(w_ref[...], x_ref[0], preferred_element_type=jnp.float32)
    o_ref[0] = (acc + b_ref[...]).astype(o_ref.dtype)


def _pad_kernel_split(x_ref, o_ref):
    # Used when c_in is a multiple of the sublane packing: both stores hit
    # disjoint, sublane-aligned vreg rows (full-width unmasked stores).
    c_in = x_ref.shape[1]
    c_out = o_ref.shape[1]
    tn = o_ref.shape[2]
    o_ref[:, :c_in, :] = x_ref[...]
    o_ref[:, c_in:, :] = jnp.zeros((1, c_out - c_in, tn), o_ref.dtype)


def _pad_kernel_dense(x_ref, o_ref):
    # Used when c_in is NOT sublane-aligned: build one dense (c_out, tn) tile
    # in vregs and issue a single unmasked store instead of two masked ones.
    c_in = x_ref.shape[1]
    c_out = o_ref.shape[1]
    tn = o_ref.shape[2]
    zeros = jnp.zeros((1, c_out - c_in, tn), o_ref.dtype)
    o_ref[...] = jnp.concatenate([x_ref[...], zeros], axis=1)


# ---------------------------------------------------------------------------
# Tiling / VMEM configuration
# ---------------------------------------------------------------------------

@functools.lru_cache(maxsize=None)
def _vmem_config():
    """Generation-aware (live_buffer_budget_bytes, vmem_limit_bytes)."""
    try:
        cap = int(pltpu.get_tpu_info().vmem_capacity_bytes)
    except Exception:
        cap = 64 * 1024 * 1024  # conservative fallback: v7x per-TC VMEM
    if cap >= 100 * 1024 * 1024:
        # v5e / v6e: 128 MiB physical VMEM -> big tiles.
        return 48 * 1024 * 1024, 64 * 1024 * 1024
    # v7x: 64 MiB physical / 32 MiB scoped default -> stay conservative.
    return 20 * 1024 * 1024, 44 * 1024 * 1024


def _pick_lane_tile(n, c_in, c_out, itemsize, vmem_budget, max_lane_tile=None):
    """Largest lane tile fitting the VMEM budget; prefer the whole row (tn==N).

    Budget counts double-buffered input + output tiles per lane.  Whole-row
    tiles are always layout-legal (block dim == array dim) and give one fully
    contiguous HBM read per (batch, channel) row.
    """
    per_lane = 2 * (c_in + c_out) * itemsize  # double-buffered in + out per lane
    cap = max(128, (vmem_budget // max(per_lane, 1)) // 128 * 128)
    if max_lane_tile is not None:  # test hook to force the multi-tile path
        cap = max(128, (min(cap, max_lane_tile) // 128) * 128)
    if n <= cap:
        return n
    return cap


# ---------------------------------------------------------------------------
# Forward
# ---------------------------------------------------------------------------

@functools.partial(jax.jit, static_argnames=("c_in", "c_out", "max_lane_tile"))
def align_forward(x, w, b, *, c_in, c_out, max_lane_tile=None):
    """Pallas implementation of Align.forward. x is NCHW."""
    B, C, T, V = x.shape
    assert C == c_in

    if c_in == c_out:
        return x

    N = T * V
    itemsize = jnp.dtype(x.dtype).itemsize
    vmem_budget, vmem_limit = _vmem_config()
    tn = _pick_lane_tile(N, c_in, c_out, itemsize, vmem_budget, max_lane_tile)
    grid = (B, pl.cdiv(N, tn))

    # Free reshape -- no transpose, stays NCHW.
    x3 = x.reshape(B, c_in, N)

    compiler_params = pltpu.CompilerParams(
        dimension_semantics=("parallel", "parallel"),
        vmem_limit_bytes=vmem_limit,
    )

    if c_in > c_out:
        # 1x1 conv == W @ X per batch, spatial axis on lanes.
        w2 = w.reshape(c_out, c_in).astype(x.dtype)
        b2 = b.reshape(c_out, 1).astype(x.dtype)
        cost = pl.CostEstimate(
            flops=2 * B * N * c_in * c_out,
            transcendentals=0,
            bytes_accessed=(B * N * (c_in + c_out) + c_out * c_in + c_out)
            * itemsize,
        )
        out = pl.pallas_call(
            _conv1x1_kernel,
            out_shape=jax.ShapeDtypeStruct((B, c_out, N), x.dtype),
            grid_spec=pltpu.PrefetchScalarGridSpec(
                num_scalar_prefetch=0,
                grid=grid,
                in_specs=[
                    pl.BlockSpec((1, c_in, tn), lambda bi, j: (bi, 0, j)),
                    pl.BlockSpec((c_out, c_in), lambda bi, j: (0, 0)),
                    pl.BlockSpec((c_out, 1), lambda bi, j: (0, 0)),
                ],
                out_specs=pl.BlockSpec((1, c_out, tn), lambda bi, j: (bi, 0, j)),
            ),
            compiler_params=compiler_params,
            cost_estimate=cost,
        )(x3, w2, b2)
    else:
        # Channel zero-padding, pure data movement.
        # TODO(synk): if the surrounding graph can treat the extra channels as
        # implicit zeros, skipping this materialization saves the whole write.
        packing = max(1, 32 // itemsize)  # sublane packing: 8 f32, 16 bf16, 32 i8
        pad_kernel = _pad_kernel_split if (c_in % packing == 0) else _pad_kernel_dense
        cost = pl.CostEstimate(
            flops=0,
            transcendentals=0,
            bytes_accessed=B * N * (c_in + c_out) * itemsize,
        )
        out = pl.pallas_call(
            pad_kernel,
            out_shape=jax.ShapeDtypeStruct((B, c_out, N), x.dtype),
            grid_spec=pltpu.PrefetchScalarGridSpec(
                num_scalar_prefetch=0,
                grid=grid,
                in_specs=[pl.BlockSpec((1, c_in, tn), lambda bi, j: (bi, 0, j))],
                out_specs=pl.BlockSpec((1, c_out, tn), lambda bi, j: (bi, 0, j)),
            ),
            compiler_params=compiler_params,
            cost_estimate=cost,
        )(x3)

    return out.reshape(B, c_out, T, V)


# ---------------------------------------------------------------------------
# Reference / init / tests
# ---------------------------------------------------------------------------

def _init_conv_params(key, c_in, c_out):
    """Deterministic init mimicking nn.Conv2d defaults (kaiming_uniform, a=sqrt(5))."""
    kw, kb = jax.random.split(key)
    fan_in = c_in  # kernel is 1x1
    bound = 1.0 / jnp.sqrt(fan_in)
    w = jax.random.uniform(kw, (c_out, c_in, 1, 1), jnp.float32, -bound, bound)
    b = jax.random.uniform(kb, (c_out,), jnp.float32, -bound, bound)
    return w, b


def _reference(x, w, b, c_in, c_out):
    """Plain-JAX reference matching the PyTorch forward."""
    if c_in > c_out:
        y = jnp.einsum("bcts,oc->bots", x, w.reshape(c_out, c_in))
        return y + b.reshape(1, c_out, 1, 1)
    elif c_in < c_out:
        B, _, T, V = x.shape
        pad = jnp.zeros((B, c_out - c_in, T, V), x.dtype)
        return jnp.concatenate([x, pad], axis=1)
    return x


if __name__ == "__main__":
    key = jax.random.PRNGKey(0)
    k1, k2, k3, k4, kp = jax.random.split(key, 5)

    B, T, V = 2, 16, 16

    # Case 1: c_in > c_out -> 1x1 conv, single whole-row lane tile (N=256).
    c_in, c_out = 8, 4
    x1 = jax.random.normal(k1, (B, c_in, T, V), jnp.float32)
    w, bias = _init_conv_params(kp, c_in, c_out)
    y1 = align_forward(x1, w, bias, c_in=c_in, c_out=c_out)
    jax.block_until_ready(y1)
    assert y1.shape == (B, c_out, T, V)
    ref1 = _reference(x1, w, bias, c_in, c_out)
    assert jnp.allclose(y1, ref1, atol=1e-5, rtol=1e-5)

    # Case 1b: conv, multi-tile grid with ragged tail (N=7500, tn forced to 512).
    T2, V2 = 300, 25
    x1b = jax.random.normal(k2, (1, c_in, T2, V2), jnp.float32)
    y1b = align_forward(x1b, w, bias, c_in=c_in, c_out=c_out, max_lane_tile=512)
    jax.block_until_ready(y1b)
    assert y1b.shape == (1, c_out, T2, V2)
    ref1b = _reference(x1b, w, bias, c_in, c_out)
    assert jnp.allclose(y1b, ref1b, atol=1e-5, rtol=1e-5)

    # Case 2: c_in < c_out with non-sublane-aligned c_in -> dense single-store pad.
    c_in2, c_out2 = 4, 8
    x2 = jax.random.normal(k3, (B, c_in2, T, V), jnp.float32)
    y2 = align_forward(x2, w, bias, c_in=c_in2, c_out=c_out2)
    jax.block_until_ready(y2)
    assert y2.shape == (B, c_out2, T, V)
    assert jnp.array_equal(y2, _reference(x2, w, bias, c_in2, c_out2))

    # Case 2b: sublane-aligned pad (c_in % 8 == 0), multi-tile + ragged tail
    # (N=800, tn forced to 256 -> 4 tiles, 32-lane tail).
    c_in3, c_out3 = 8, 16
    T3, V3 = 40, 20
    x3 = jax.random.normal(k4, (B, c_in3, T3, V3), jnp.float32)
    y3 = align_forward(x3, w, bias, c_in=c_in3, c_out=c_out3, max_lane_tile=256)
    jax.block_until_ready(y3)
    assert y3.shape == (B, c_out3, T3, V3)
    assert jnp.array_equal(y3, _reference(x3, w, bias, c_in3, c_out3))

    # Case 3: c_in == c_out -> identity.
    c_in4 = c_out4 = 4
    x4 = jax.random.normal(k1, (B, c_in4, T, V), jnp.float32)
    y4 = align_forward(x4, w, bias, c_in=c_in4, c_out=c_out4)
    jax.block_until_ready(y4)
    assert jnp.array_equal(y4, x4)

    print("KERNEL_OK")
</pallas_src>

<mosaic_0001>
module attributes {stable_mosaic.version = 11 : i64} {
  func.func @_conv1x1_kernel(%arg0: i32, %arg1: i32, %arg2: memref<1x8x256xf32, #tpu.memory_space<vmem>>, %arg3: memref<4x8xf32, #tpu.memory_space<vmem>>, %arg4: memref<4x1xf32, #tpu.memory_space<vmem>>, %arg5: memref<1x4x256xf32, #tpu.memory_space<vmem>>) attributes {dimension_semantics = [#tpu.dimension_semantics<parallel>, #tpu.dimension_semantics<parallel>], iteration_bounds = array<i64: 2, 1>, scalar_prefetch = 0 : i64, scratch_operands = 0 : i64, tpu.core_type = #tpu.core_type<tc>, window_params = [{transform_indices = @transform_0, window_bounds = array<i64: 1, 8, 256>}, {pipeline_mode = #tpu.pipeline_mode<synchronous>, transform_indices = @transform_1, window_bounds = array<i64: 4, 8>}, {pipeline_mode = #tpu.pipeline_mode<synchronous>, transform_indices = @transform_2, window_bounds = array<i64: 4, 1>}, {transform_indices = @transform_3, window_bounds = array<i64: 1, 4, 256>}]} {
    %c0 = arith.constant 0 : index
    %c0_0 = arith.constant 0 : index
    %0 = vector.load %arg3[%c0, %c0_0] : memref<4x8xf32, #tpu.memory_space<vmem>>, vector<4x8xf32>
    %c0_1 = arith.constant 0 : index
    %c0_2 = arith.constant 0 : index
    %c0_3 = arith.constant 0 : index
    %1 = vector.load %arg2[%c0_1, %c0_2, %c0_3] : memref<1x8x256xf32, #tpu.memory_space<vmem>>, vector<1x8x256xf32>
    %2 = vector.shape_cast %1 : vector<1x8x256xf32> to vector<8x256xf32>
    %cst = arith.constant dense<0.000000e+00> : vector<4x256xf32>
    %3 = tpu.matmul %0, %2, %cst {dimension_numbers = #tpu.dot_dimension_numbers<[1], [0], [0], [1], [0, 0, 1, 1], [], []>} : vector<4x8xf32>, vector<8x256xf32>, vector<4x256xf32> -> vector<4x256xf32>
    %c0_4 = arith.constant 0 : index
    %c0_5 = arith.constant 0 : index
    %4 = vector.load %arg4[%c0_4, %c0_5] : memref<4x1xf32, #tpu.memory_space<vmem>>, vector<4x1xf32>
    %5 = vector.broadcast %4 : vector<4x1xf32> to vector<4x256xf32>
    %6 = arith.addf %3, %5 : vector<4x256xf32>
    %c0_6 = arith.constant 0 : index
    %c0_7 = arith.constant 0 : index
    %c0_8 = arith.constant 0 : index
    %7 = vector.load %arg5[%c0_6, %c0_7, %c0_8] : memref<1x4x256xf32, #tpu.memory_space<vmem>>, vector<1x4x256xf32>
    %8 = vector.shape_cast %7 : vector<1x4x256xf32> to vector<4x256xf32>
    %9 = vector.shape_cast %6 : vector<4x256xf32> to vector<1x4x256xf32>
    tpu.vector_store %arg5[%c0_6, %c0_7, %c0_8], %9 {strides = array<i32>} : memref<1x4x256xf32, #tpu.memory_space<vmem>>, vector<1x4x256xf32>,
    return
  }
  func.func @transform_0(%arg0: i32, %arg1: i32) -> (i32, i32, i32) {
    %c0_i32 = arith.constant 0 : i32
    %c0_i32_0 = arith.constant 0 : i32
    return %arg0, %c0_i32, %arg1 : i32, i32, i32
  }
  func.func @transform_1(%arg0: i32, %arg1: i32) -> (i32, i32) {
    %c0_i32 = arith.constant 0 : i32
    %c0_i32_0 = arith.constant 0 : i32
    %c0_i32_1 = arith.constant 0 : i32
    return %c0_i32, %c0_i32_0 : i32, i32
  }
  func.func @transform_2(%arg0: i32, %arg1: i32) -> (i32, i32) {
    %c0_i32 = arith.constant 0 : i32
    %c0_i32_0 = arith.constant 0 : i32
    %c0_i32_1 = arith.constant 0 : i32
    return %c0_i32, %c0_i32_0 : i32, i32
  }
  func.func @transform_3(%arg0: i32, %arg1: i32) -> (i32, i32, i32) {
    %c0_i32 = arith.constant 0 : i32
    %c0_i32_0 = arith.constant 0 : i32
    return %arg0, %c0_i32, %arg1 : i32, i32, i32
  }
}

</mosaic_0001>

<bundles_post_ra>
// kernel: align_forward.1
= control target key start
LH: loop header
LB: loop body
LE: loop exit
PB: predicated region body
PF: predicated region fallthrough
CT: control target
= control target key end

     0   :  { %s473_s12 = smov 0   ;;  %s475_s13 = smov 0   ;;  %s512_s0 = inlined_call_operand.vmem [shape: f32[2,8,256], index: 0, kind: input, shape index: {}]   ;;  %s513_s1 = inlined_call_operand.vmem [shape: f32[4,8], index: 1, kind: input, shape index: {}]   ;;  %s514_s2 = inlined_call_operand.vmem [shape: f32[4,1], index: 2, kind: input, shape index: {}]   ;;  %s515_s3 = inlined_call_operand.vmem [shape: f32[2,4,256], index: 3, kind: output, shape index: {}]  }
   0x1   :  { %s477_s14 = smov 0  }
   0x2 LB: > { %s25_s15 = sadd.s32 1, %s445_s13  ;;  %p390_p0 = scmp.ge.s32.totalorder %s449_s14, 1  ;;  %s449_s14 = sphi %s477_s14, %s13_s14   ;;  %s445_s13 = sphi %s475_s13, %s517_s13   ;;  %s441_s12 = sphi %s473_s12, %s516_s12  }
   0x3   : > { %p27_p1 = scmp.ge.s32.totalorder %s25_s15, 2  ;;  %p158_p2 = scmp.lt.s32.totalorder %s449_s14, 3 }
   0x5   : > { %s519_s15 = smov (%p27_p1, %s25_s15), 0  ;;  %p159_p3 = pnand %p390_p0, %p158_p2 }
   0x6   : > { %p191_p4 = scmp.lt.s32.totalorder (!%p159_p3), %s441_s12, 1 }
   0x7   : > { %162 = sbr.rel (%p159_p3) target bundleno = 218 (0xda), region = 32 }
   0xc   : > { %v451_v0 = vmov 0.0   ;;  %v452_v1 = vmov 0   ;;  %v213_v2 = vld [vmem:[%s514_s2] sm:$0xf]  ;;  %s521_s12 = smov (!%p191_p4, %s441_s12), 1  ;;  %vm219_vm0 = vcmask 64512  }
   0xd   : > { %287 = vmatprep.mubr.f32.mxu0 %v451_v0  ;;  %426 = vset.pattern.permute.xlu0 %v452_v1  ;;  %s398_s18 = sshll.u32 %s521_s12, 4  ;;  %v210_v5 = vld [vmem:[%s513_s1] sm:$0xf]  ;;  %s399_s24 = sshll.u32 %s521_s12, 3 }
   0xe   : > { %216 = vperm.xlu0 %426, %v213_v2   ;;  %s198_s21 = scalar_lea.vmem %s512_s0, %s398_s18  ;;  %s208_s27 = scalar_lea.vmem %s515_s3, %s399_s24 }
   0xf   : > { %v212_v3 = vld [vmem:[%s198_s21 + $0x8] sm:$0xff]  ;;  %v211_v4 = vld [vmem:[%s198_s21] sm:$0xff] }
  0x10   : > { %253 = vmatprep.subr.mxu0 %v212_v3 }
  0x11   : > { %254 = vmatpush1.msra.mxu0 %v211_v4 }
  0x12   : > { %395 = vmatmul.mubr.msk.f32.vlgmr.msra.gmra.mxu0 %vm219_vm0, %v210_v5 }
  0x89   : > { %v217_v6 = vpop.permute.xlu0 %216 }
  0xd2   : > { %v289_v7 = vpop.f32.mrf.mxu0 }
  0xd3   : > { %v290_v9 = vadd.f32 %v289_v7, %v217_v6 }
  0xd4   : > { %v291_v8 = vpop.f32.mrf.mxu0 }
  0xd5   : > { %v292_v10 = vadd.f32 %v291_v8, %v217_v6 }
  0xd7   : > { %v296_v11 = vcombine.low %v290_v9, %v292_v10 }
  0xd9   : > { %298 = vst [vmem:[%s208_s27] sm:$0xff] %v296_v11 }
  0xda PF: > { %s13_s14 = sadd.s32 1, %s449_s14   ;;  %s516_s12 = smov %s445_s13 }
  0xdb   : > { %p10_p5 = scmp.ge.s32.totalorder %s13_s14, 4   ;;  %s517_s13 = smov %s519_s15 }
  0xdd   :  { %12 = sbr.rel (!%p10_p5) target bundleno = 2 (0x2), region = 62 }

</bundles_post_ra>
